<compile_context>
chip_gen: v6e
topology: v6e:2x2x1
jax: 0.10.0
libtpu: 0.0.40
codegen_flags: <defaults>
</compile_context>

<pallas_src>
import math

import jax
import jax.numpy as jnp
from jax.experimental import pallas as pl
from jax.experimental.pallas import tpu as pltpu


def _round_up(a: int, b: int) -> int:
    return ((a + b - 1) // b) * b


def _ffn_kernel(x_ref, w13_ref, w2_ref, o_ref, acc_ref):
    # x_ref:   (tm, dim)
    # w13_ref: (dim, 2*tn)   -- [:, :tn] is the w1 block, [:, tn:] is the w3 block
    # w2_ref:  (tn, dim)
    # o_ref:   (tm, dim)
    # acc_ref: (tm, dim) f32 scratch, resident across the hidden reduction
    h = pl.program_id(1)

    @pl.when(h == 0)
    def _init():
        acc_ref[...] = jnp.zeros_like(acc_ref)

    x = x_ref[...]
    # One MXU pass produces both gate operands: [tm, 2*tn] in f32.
    h13 = jnp.dot(x, w13_ref[...], preferred_element_type=jnp.float32)
    tn = w13_ref.shape[-1] // 2
    h1 = h13[:, :tn]
    h3 = h13[:, tn:]
    # SwiGLU gate in f32 (elementwise on VPU/EUP).
    g = (h1 * jax.nn.sigmoid(h1)) * h3
    # Down-projection partial sum for this hidden block, accumulated in f32.
    acc_ref[...] += jnp.dot(g.astype(w2_ref.dtype), w2_ref[...],
                            preferred_element_type=jnp.float32)

    @pl.when(h == pl.num_programs(1) - 1)
    def _store():
        o_ref[...] = acc_ref[...].astype(o_ref.dtype)


def feed_forward(x, w1, w3, w2, *, tm=256, tn=512):
    """x: (tokens, dim); w1, w3: (dim, hidden); w2: (hidden, dim)."""
    T, dim = x.shape
    hidden = w1.shape[1]
    assert w1.shape == (dim, hidden)
    assert w3.shape == (dim, hidden)
    assert w2.shape == (hidden, dim)

    # ---- token tile selection (sublane-safe for both f32 and bf16) ----
    sub = 16
    tm = max(sub, min(tm, _round_up(T, sub)))
    tm = _round_up(tm, sub)
    Tp = _round_up(T, tm)

    # ---- hidden tile selection ----
    tn = min(tn, hidden)
    if hidden % tn != 0:
        # Fallback: single hidden step (correctness over perf for odd sizes).
        tn = hidden
    nh = hidden // tn

    # ---- pad tokens so the grid covers them exactly ----
    x_in = x if Tp == T else jnp.pad(x, ((0, Tp - T), (0, 0)))

    # ---- pack w1/w3 so each hidden block h is one contiguous (dim, 2*tn) tile:
    #      [ w1[:, h*tn:(h+1)*tn] | w3[:, h*tn:(h+1)*tn] ]
    w13 = jnp.concatenate(
        [w1.reshape(dim, nh, tn), w3.reshape(dim, nh, tn)], axis=-1
    ).reshape(dim, nh * 2 * tn)

    grid = (Tp // tm, nh)

    # ---- VMEM budget for the chosen tiles (double-buffered ins/outs + acc) ----
    bpe_x = jnp.dtype(x.dtype).itemsize
    bpe_w = jnp.dtype(w13.dtype).itemsize
    tile_bytes = (2 * tm * dim * bpe_x            # x tiles
                  + 2 * dim * (2 * tn) * bpe_w    # packed w1|w3 tiles
                  + 2 * tn * dim * bpe_w          # w2 tiles
                  + 2 * tm * dim * bpe_x          # output tiles
                  + tm * dim * 4)                 # f32 accumulator
    vmem_limit = int(tile_bytes * 1.5) + (4 << 20)
    vmem_limit = max(32 << 20, min(vmem_limit, 100 << 20))

    # ---- advisory cost estimate for the XLA scheduler ----
    flops = 6 * Tp * dim * hidden                # 2*T*d*h for each of the 3 matmuls
    transcendentals = Tp * hidden                # sigmoid
    bytes_accessed = (Tp * dim * bpe_x                                   # read x
                      + grid[0] * 3 * dim * hidden * bpe_w               # streamed weights
                      + Tp * dim * bpe_x)                                # write out
    cost = pl.CostEstimate(flops=flops,
                           transcendentals=transcendentals,
                           bytes_accessed=bytes_accessed)

    out = pl.pallas_call(
        _ffn_kernel,
        out_shape=jax.ShapeDtypeStruct((Tp, dim), x.dtype),
        grid_spec=pltpu.PrefetchScalarGridSpec(
            num_scalar_prefetch=0,
            grid=grid,
            in_specs=[
                # x tile: resident across the hidden reduction (no h in map)
                pl.BlockSpec((tm, dim), lambda i, h: (i, 0)),
                # packed [w1|w3] tile for hidden block h
                pl.BlockSpec((dim, 2 * tn), lambda i, h: (0, h)),
                # w2 tile for hidden block h
                pl.BlockSpec((tn, dim), lambda i, h: (h, 0)),
            ],
            out_specs=pl.BlockSpec((tm, dim), lambda i, h: (i, 0)),
            scratch_shapes=[pltpu.VMEM((tm, dim), jnp.float32)],
        ),
        compiler_params=pltpu.CompilerParams(
            dimension_semantics=("parallel", "arbitrary"),
            vmem_limit_bytes=vmem_limit),
        cost_estimate=cost,
    )(x_in, w13, w2)

    return out[:T] if Tp != T else out


def init_params(key, dim, hidden_dim, multiple_of, ffn_dim_multiplier,
                dtype=jnp.float32):
    # Mirror the PyTorch __init__ hidden-dim arithmetic.
    if ffn_dim_multiplier is not None:
        hidden_dim = int(ffn_dim_multiplier * hidden_dim)
    hidden_dim = multiple_of * ((hidden_dim + multiple_of - 1) // multiple_of)

    k1, k2, k3 = jax.random.split(key, 3)

    # nn.Linear default init: U(-1/sqrt(fan_in), 1/sqrt(fan_in)); bias=False.
    def linear_w(k, fan_in, fan_out):
        bound = 1.0 / math.sqrt(fan_in)
        # stored as [in, out] (transposed vs. PyTorch) for row-major matmul
        return jax.random.uniform(k, (fan_in, fan_out), dtype, -bound, bound)

    w1 = linear_w(k1, dim, hidden_dim)          # (dim, hidden)
    w2 = linear_w(k2, hidden_dim, dim)          # (hidden, dim)
    w3 = linear_w(k3, dim, hidden_dim)          # (dim, hidden)
    return w1, w2, w3, hidden_dim


if __name__ == "__main__":
    key = jax.random.PRNGKey(0)
    kx, kp = jax.random.split(key)

    # Small-but-lane-dense toy config: dim is a multiple of 128 so output
    # stores are unmasked; FeedForward(dim, 4*dim, multiple_of=32, None).
    batch, seq, dim = 2, 8, 128
    w1, w2, w3, hidden_dim = init_params(kp, dim, 4 * dim, 32, None,
                                         dtype=jnp.float32)

    x = jax.random.normal(kx, (batch, seq, dim), jnp.float32)
    x2d = x.reshape(batch * seq, dim)           # layout: [tokens, dim]

    # ---- f32 path ----
    out2d = feed_forward(x2d, w1, w3, w2)
    out = out2d.reshape(batch, seq, dim)
    jax.block_until_ready(out)

    h1 = x2d @ w1
    ref = ((h1 * jax.nn.sigmoid(h1)) * (x2d @ w3)) @ w2
    ref = ref.reshape(batch, seq, dim)
    assert jnp.allclose(out, ref, atol=1e-3, rtol=1e-3), "f32 mismatch vs reference"

    # ---- bf16 path (recommended production dtype: bf16 MXU, f32 accumulation) ----
    xb = x2d.astype(jnp.bfloat16)
    w1b = w1.astype(jnp.bfloat16)
    w2b = w2.astype(jnp.bfloat16)
    w3b = w3.astype(jnp.bfloat16)
    outb = feed_forward(xb, w1b, w3b, w2b)
    jax.block_until_ready(outb)

    h1b = jnp.dot(xb, w1b, preferred_element_type=jnp.float32)
    h3b = jnp.dot(xb, w3b, preferred_element_type=jnp.float32)
    gb = ((h1b * jax.nn.sigmoid(h1b)) * h3b).astype(jnp.bfloat16)
    refb = jnp.dot(gb, w2b, preferred_element_type=jnp.float32).astype(jnp.bfloat16)
    assert jnp.allclose(outb.astype(jnp.float32), refb.astype(jnp.float32),
                        atol=5e-2, rtol=5e-2), "bf16 mismatch vs reference"

    print("KERNEL_OK")
</pallas_src>

<mosaic_0001>
module attributes {stable_mosaic.version = 11 : i64} {
  func.func @_ffn_kernel(%arg0: i32, %arg1: i32, %arg2: memref<16x128xf32, #tpu.memory_space<vmem>>, %arg3: memref<128x1024xf32, #tpu.memory_space<vmem>>, %arg4: memref<512x128xf32, #tpu.memory_space<vmem>>, %arg5: memref<16x128xf32, #tpu.memory_space<vmem>>, %arg6: memref<16x128xf32, #tpu.memory_space<vmem>>) attributes {dimension_semantics = [#tpu.dimension_semantics<parallel>, #tpu.dimension_semantics<arbitrary>], iteration_bounds = array<i64: 1, 1>, scalar_prefetch = 0 : i64, scratch_operands = 1 : i64, tpu.core_type = #tpu.core_type<tc>, window_params = [{transform_indices = @transform_0, window_bounds = array<i64: 16, 128>}, {transform_indices = @transform_1, window_bounds = array<i64: 128, 1024>}, {transform_indices = @transform_2, window_bounds = array<i64: 512, 128>}, {transform_indices = @transform_3, window_bounds = array<i64: 16, 128>}]} {
    %c0_i32 = arith.constant 0 : i32
    %0 = arith.cmpi eq, %arg1, %c0_i32 : i32
    %1 = arith.extui %0 : i1 to i32
    %c0_i32_0 = arith.constant 0 : i32
    %2 = arith.cmpi ne, %1, %c0_i32_0 : i32
    scf.if %2 {
      %cst_14 = arith.constant 0.000000e+00 : f32
      %23 = vector.broadcast %cst_14 : f32 to vector<16x128xf32>
      %c0_15 = arith.constant 0 : index
      %c0_16 = arith.constant 0 : index
      %24 = vector.load %arg6[%c0_15, %c0_16] : memref<16x128xf32, #tpu.memory_space<vmem>>, vector<16x128xf32>
      tpu.vector_store %arg6[%c0_15, %c0_16], %23 {strides = array<i32>} : memref<16x128xf32, #tpu.memory_space<vmem>>, vector<16x128xf32>,
    } else {
    }
    %c0 = arith.constant 0 : index
    %c0_1 = arith.constant 0 : index
    %3 = vector.load %arg2[%c0, %c0_1] : memref<16x128xf32, #tpu.memory_space<vmem>>, vector<16x128xf32>
    %c0_2 = arith.constant 0 : index
    %c0_3 = arith.constant 0 : index
    %4 = vector.load %arg3[%c0_2, %c0_3] : memref<128x1024xf32, #tpu.memory_space<vmem>>, vector<128x1024xf32>
    %cst = arith.constant dense<0.000000e+00> : vector<16x1024xf32>
    %5 = tpu.matmul %3, %4, %cst {dimension_numbers = #tpu.dot_dimension_numbers<[1], [0], [0], [1], [0, 0, 1, 1], [], []>} : vector<16x128xf32>, vector<128x1024xf32>, vector<16x1024xf32> -> vector<16x1024xf32>
    %6 = vector.extract_strided_slice %5 {offsets = [0, 0], sizes = [16, 512], strides = [1, 1]} : vector<16x1024xf32> to vector<16x512xf32>
    %7 = vector.extract_strided_slice %5 {offsets = [0, 512], sizes = [16, 512], strides = [1, 1]} : vector<16x1024xf32> to vector<16x512xf32>
    %8 = arith.negf %6 : vector<16x512xf32>
    %9 = math.exp %8 : vector<16x512xf32>
    %cst_4 = arith.constant 1.000000e+00 : f32
    %10 = vector.broadcast %cst_4 : f32 to vector<16x512xf32>
    %11 = arith.addf %10, %9 : vector<16x512xf32>
    %12 = arith.divf %10, %11 : vector<16x512xf32>
    %13 = arith.mulf %6, %12 : vector<16x512xf32>
    %14 = arith.mulf %13, %7 : vector<16x512xf32>
    %c0_5 = arith.constant 0 : index
    %c0_6 = arith.constant 0 : index
    %15 = vector.load %arg6[%c0_5, %c0_6] : memref<16x128xf32, #tpu.memory_space<vmem>>, vector<16x128xf32>
    %c0_7 = arith.constant 0 : index
    %c0_8 = arith.constant 0 : index
    %16 = vector.load %arg4[%c0_7, %c0_8] : memref<512x128xf32, #tpu.memory_space<vmem>>, vector<512x128xf32>
    %cst_9 = arith.constant dense<0.000000e+00> : vector<16x128xf32>
    %17 = tpu.matmul %14, %16, %cst_9 {dimension_numbers = #tpu.dot_dimension_numbers<[1], [0], [0], [1], [0, 0, 1, 1], [], []>} : vector<16x512xf32>, vector<512x128xf32>, vector<16x128xf32> -> vector<16x128xf32>
    %18 = arith.addf %15, %17 : vector<16x128xf32>
    %c0_10 = arith.constant 0 : index
    %c0_11 = arith.constant 0 : index
    %19 = vector.load %arg6[%c0_10, %c0_11] : memref<16x128xf32, #tpu.memory_space<vmem>>, vector<16x128xf32>
    tpu.vector_store %arg6[%c0_10, %c0_11], %18 {strides = array<i32>} : memref<16x128xf32, #tpu.memory_space<vmem>>, vector<16x128xf32>,
    %c0_i32_12 = arith.constant 0 : i32
    %20 = arith.cmpi eq, %arg1, %c0_i32_12 : i32
    %21 = arith.extui %20 : i1 to i32
    %c0_i32_13 = arith.constant 0 : i32
    %22 = arith.cmpi ne, %21, %c0_i32_13 : i32
    scf.if %22 {
      %c0_14 = arith.constant 0 : index
      %c0_15 = arith.constant 0 : index
      %23 = vector.load %arg6[%c0_14, %c0_15] : memref<16x128xf32, #tpu.memory_space<vmem>>, vector<16x128xf32>
      %c0_16 = arith.constant 0 : index
      %c0_17 = arith.constant 0 : index
      %24 = vector.load %arg5[%c0_16, %c0_17] : memref<16x128xf32, #tpu.memory_space<vmem>>, vector<16x128xf32>
      tpu.vector_store %arg5[%c0_16, %c0_17], %23 {strides = array<i32>} : memref<16x128xf32, #tpu.memory_space<vmem>>, vector<16x128xf32>,
    } else {
    }
    return
  }
  func.func @transform_0(%arg0: i32, %arg1: i32) -> (i32, i32) {
    %c0_i32 = arith.constant 0 : i32
    %c0_i32_0 = arith.constant 0 : i32
    return %arg0, %c0_i32 : i32, i32
  }
  func.func @transform_1(%arg0: i32, %arg1: i32) -> (i32, i32) {
    %c0_i32 = arith.constant 0 : i32
    %c0_i32_0 = arith.constant 0 : i32
    return %c0_i32, %arg1 : i32, i32
  }
  func.func @transform_2(%arg0: i32, %arg1: i32) -> (i32, i32) {
    %c0_i32 = arith.constant 0 : i32
    %c0_i32_0 = arith.constant 0 : i32
    return %arg1, %c0_i32 : i32, i32
  }
  func.func @transform_3(%arg0: i32, %arg1: i32) -> (i32, i32) {
    %c0_i32 = arith.constant 0 : i32
    %c0_i32_0 = arith.constant 0 : i32
    return %arg0, %c0_i32 : i32, i32
  }
}

</mosaic_0001>

<bundles_post_ra>
// kernel: tpu_custom_call.1
= control target key start
LH: loop header
LB: loop body
LE: loop exit
PB: predicated region body
PF: predicated region fallthrough
CT: control target
= control target key end

     0   :  { %8 = vsyncpa [#allocation4], 0  ;;  %s1090_s0 = inlined_call_operand.hbm [shape: f32[16,128], index: 0, kind: input, shape index: {}]   ;;  %s1091_s1 = inlined_call_operand.hbm [shape: f32[128,1024], index: 1, kind: input, shape index: {}]   ;;  %s1092_s2 = inlined_call_operand.hbm [shape: f32[512,128], index: 2, kind: input, shape index: {}]   ;;  %s1093_s3 = inlined_call_operand.hbm [shape: f32[16,128], index: 3, kind: output, shape index: {}]  }
   0x1   :  { %9 = vsyncpa [#allocation7], 0 }
   0x2   :  { %10 = vsyncpa [#allocation5], 0  ;;  %s1020_s12 = smov [#allocation6]  }
   0x3   :  { %s28_s13 = sshll.u32 %s1020_s12, 4  ;;  %s29_s13 = int_to_ptr.vmem [resolvable:$true] %s28_s13 }
   0x4   :  { %s942_s14 = scalar_lea.vmem %s29_s13, 16384  ;;  %p947_p1 = scmp.lt.s32.totalorder %s29_s13, %s29_s13 }
   0x5   :  { %p943_p0 = scmp.ne.s32.totalorder %s29_s13, %s942_s14  ;;  %p948_p2 = scmp.lt.s32.totalorder %s942_s14, %s942_s14 }
   0x7   :  { %p949_p3 = por %p948_p2, %p947_p1 }
   0x9   :  { %p950_p4 = pnand %p949_p3, %p943_p0 }
   0xb   :  { %953 = shalt.err (!%p950_p4)
}
   0xc   :  { %s1021_s15 = smov 1024   ;;  %s1022_s16 = smov 64  }
   0xd   :  { %34 = dma.hbm_to_vmem [thread:$0]  %s1091_s1, 16384, %s29_s13, [#allocation7], %s1021_s15, %s1021_s15, %s1022_s16  }
   0xe   :  { %s1023_s19 = smov [#allocation3]  }
   0xf   :  { %s16_s20 = sshll.u32 %s1023_s19, 4  ;;  %s17_s20 = int_to_ptr.vmem [resolvable:$true] %s16_s20 }
  0x10   :  { %s962_s21 = scalar_lea.vmem %s17_s20, 256  ;;  %p967_p6 = scmp.lt.s32.totalorder %s17_s20, %s17_s20 }
  0x11   :  { %p963_p5 = scmp.ne.s32.totalorder %s17_s20, %s962_s21  ;;  %p968_p7 = scmp.lt.s32.totalorder %s962_s21, %s962_s21 }
  0x13   :  { %p969_p8 = por %p968_p7, %p967_p6 }
  0x15   :  { %p970_p9 = pnand %p969_p8, %p963_p5 }
  0x17   :  { %973 = shalt.err (!%p970_p9)
}
  0x18   :  { %s1024_s22 = smov 128   ;;  %s1025_s23 = smov 8  }
  0x19   :  { %22 = dma.hbm_to_vmem [thread:$0]  %s1090_s0, 256, %s17_s20, [#allocation4], %s1024_s22, %s1024_s22, %s1025_s23  }
  0x1a   :  { %s1026_s1 = smov [#allocation8]  }
  0x1b   :  { %s40_s26 = sshll.u32 %s1026_s1, 4  ;;  %s41_s26 = int_to_ptr.vmem [resolvable:$true] %s40_s26 }
  0x1c   :  { %s982_s27 = scalar_lea.vmem %s41_s26, 8192  ;;  %p987_p11 = scmp.lt.s32.totalorder %s41_s26, %s41_s26 }
  0x1d   :  { %p983_p10 = scmp.ne.s32.totalorder %s41_s26, %s982_s27  ;;  %p988_p12 = scmp.lt.s32.totalorder %s982_s27, %s982_s27 }
  0x1f   :  { %p989_p13 = por %p988_p12, %p987_p11 }
  0x21   :  { %p990_p0 = pnand %p989_p13, %p983_p10 }
  0x23   :  { %993 = shalt.err (!%p990_p0)
}
  0x24   :  { %46 = dma.hbm_to_vmem [thread:$0]  %s1092_s2, 8192, %s41_s26, [#allocation7], %s1024_s22, %s1024_s22, %s1025_s23  }
  0x25   :  { %1014 = dma.done.wait [#allocation4], 256  }
  0x26   :  { %1015 = vsyncadd [#allocation4], 4294967040 }
  0x27   :  { %1016 = dma.done.wait [#allocation7], 24576  }
  0x28   :  { %1017 = vsyncadd [#allocation7], 4294942720  ;;  %v1027_v0 = vmov 0.0   ;;  %v185_v1 = vld [vmem:[#allocation6 + $0x3c8] sm:$0xff]  ;;  %v187_v2 = vld [vmem:[#allocation6 + $0x3d8] sm:$0xff]  ;;  %s1028_s0 = smov [#allocation9]  }
  0x29   :  { %256 = vmatprep.mubr.f32.mxu0 %v1027_v0  ;;  %333 = vmatprep.mubr.f32.mxu1 %v1027_v0  ;;  %v184_v3 = vld [vmem:[#allocation6 + $0x3c0] sm:$0xff]  ;;  %v186_v4 = vld [vmem:[#allocation6 + $0x3d0] sm:$0xff]  ;;  %v177_v5 = vld [vmem:[#allocation6 + $0x388] sm:$0xff]  ;;  %s796_s2 = sshll.u32 %s1028_s0, 4  ;;  %s797_s2 = int_to_ptr.vmem [resolvable:$true] %s796_s2 }
  0x2a   :  { %192 = vmatprep.subr.mxu0 %v185_v1  ;;  %269 = vmatprep.subr.mxu1 %v187_v2  ;;  %v179_v6 = vld [vmem:[#allocation6 + $0x398] sm:$0xff]  ;;  %v176_v7 = vld [vmem:[#allocation6 + $0x380] sm:$0xff]  ;;  %v178_v8 = vld [vmem:[#allocation6 + $0x390] sm:$0xff]  ;;  %s994_s30 = scalar_lea.vmem %s797_s2, 256  ;;  %p999_p2 = scmp.lt.s32.totalorder %s797_s2, %s797_s2 }
  0x2b   :  { %193 = vmatpush1.msra.mxu0 %v184_v3  ;;  %270 = vmatpush1.msra.mxu1 %v186_v4  ;;  %v169_v9 = vld [vmem:[#allocation6 + $0x348] sm:$0xff]  ;;  %v171_v10 = vld [vmem:[#allocation6 + $0x358] sm:$0xff]  ;;  %v168_v11 = vld [vmem:[#allocation6 + $0x340] sm:$0xff]  ;;  %p995_p1 = scmp.ne.s32.totalorder %s797_s2, %s994_s30  ;;  %p1000_p3 = scmp.lt.s32.totalorder %s994_s30, %s994_s30 }
  0x2c   :  { %194 = vmatprep.subr.mxu0 %v177_v5  ;;  %271 = vmatprep.subr.mxu1 %v179_v6  ;;  %v170_v12 = vld [vmem:[#allocation6 + $0x350] sm:$0xff]  ;;  %v161_v13 = vld [vmem:[#allocation6 + $0x308] sm:$0xff]  ;;  %v163_v14 = vld [vmem:[#allocation6 + $0x318] sm:$0xff] }
  0x2d   :  { %195 = vmatpush1.msra.mxu0 %v176_v7  ;;  %272 = vmatpush1.msra.mxu1 %v178_v8  ;;  %v160_v15 = vld [vmem:[#allocation6 + $0x300] sm:$0xff]  ;;  %v162_v16 = vld [vmem:[#allocation6 + $0x310] sm:$0xff]  ;;  %v153_v17 = vld [vmem:[#allocation6 + $0x2c8] sm:$0xff]  ;;  %p1001_p4 = por %p1000_p3, %p999_p2 }
  0x2e   :  { %196 = vmatprep.subr.mxu0 %v169_v9  ;;  %273 = vmatprep.subr.mxu1 %v171_v10  ;;  %v155_v18 = vld [vmem:[#allocation6 + $0x2d8] sm:$0xff]  ;;  %v152_v19 = vld [vmem:[#allocation6 + $0x2c0] sm:$0xff]  ;;  %v154_v20 = vld [vmem:[#allocation6 + $0x2d0] sm:$0xff] }
  0x2f   :  { %197 = vmatpush1.msra.mxu0 %v168_v11  ;;  %274 = vmatpush1.msra.mxu1 %v170_v12  ;;  %v145_v21 = vld [vmem:[#allocation6 + $0x288] sm:$0xff]  ;;  %v147_v22 = vld [vmem:[#allocation6 + $0x298] sm:$0xff]  ;;  %v144_v23 = vld [vmem:[#allocation6 + $0x280] sm:$0xff]  ;;  %p1002_p5 = pnand %p1001_p4, %p995_p1 }
  0x30   :  { %198 = vmatprep.subr.mxu0 %v161_v13  ;;  %275 = vmatprep.subr.mxu1 %v163_v14  ;;  %v146_v24 = vld [vmem:[#allocation6 + $0x290] sm:$0xff]  ;;  %v137_v25 = vld [vmem:[#allocation6 + $0x248] sm:$0xff]  ;;  %v139_v26 = vld [vmem:[#allocation6 + $0x258] sm:$0xff] }
  0x31   :  { %199 = vmatpush1.msra.mxu0 %v160_v15  ;;  %276 = vmatpush1.msra.mxu1 %v162_v16  ;;  %v136_v27 = vld [vmem:[#allocation6 + $0x240] sm:$0xff]  ;;  %v138_v28 = vld [vmem:[#allocation6 + $0x250] sm:$0xff]  ;;  %v129_v29 = vld [vmem:[#allocation6 + $0x208] sm:$0xff] }
  0x32   :  { %200 = vmatprep.subr.mxu0 %v153_v17  ;;  %277 = vmatprep.subr.mxu1 %v155_v18  ;;  %v131_v30 = vld [vmem:[#allocation6 + $0x218] sm:$0xff]  ;;  %v128_v31 = vld [vmem:[#allocation6 + $0x200] sm:$0xff]  ;;  %v130_v32 = vld [vmem:[#allocation6 + $0x210] sm:$0xff] }
  0x33   :  { %201 = vmatpush1.msra.mxu0 %v152_v19  ;;  %278 = vmatpush1.msra.mxu1 %v154_v20  ;;  %v121_v33 = vld [vmem:[#allocation6 + $0x1c8] sm:$0xff]  ;;  %v123_v34 = vld [vmem:[#allocation6 + $0x1d8] sm:$0xff]  ;;  %v120_v35 = vld [vmem:[#allocation6 + $0x1c0] sm:$0xff] }
  0x34   :  { %202 = vmatprep.subr.mxu0 %v145_v21  ;;  %279 = vmatprep.subr.mxu1 %v147_v22  ;;  %v122_v36 = vld [vmem:[#allocation6 + $0x1d0] sm:$0xff]  ;;  %v113_v37 = vld [vmem:[#allocation6 + $0x188] sm:$0xff]  ;;  %v115_v38 = vld [vmem:[#allocation6 + $0x198] sm:$0xff] }
  0x35   :  { %203 = vmatpush1.msra.mxu0 %v144_v23  ;;  %280 = vmatpush1.msra.mxu1 %v146_v24  ;;  %v112_v39 = vld [vmem:[#allocation6 + $0x180] sm:$0xff]  ;;  %v114_v40 = vld [vmem:[#allocation6 + $0x190] sm:$0xff]  ;;  %v105_v41 = vld [vmem:[#allocation6 + $0x148] sm:$0xff] }
  0x36   :  { %204 = vmatprep.subr.mxu0 %v137_v25  ;;  %281 = vmatprep.subr.mxu1 %v139_v26  ;;  %v107_v42 = vld [vmem:[#allocation6 + $0x158] sm:$0xff]  ;;  %v104_v43 = vld [vmem:[#allocation6 + $0x140] sm:$0xff]  ;;  %v106_v44 = vld [vmem:[#allocation6 + $0x150] sm:$0xff] }
  0x37   :  { %205 = vmatpush1.msra.mxu0 %v136_v27  ;;  %282 = vmatpush1.msra.mxu1 %v138_v28  ;;  %v97_v45 = vld [vmem:[#allocation6 + $0x108] sm:$0xff]  ;;  %v99_v46 = vld [vmem:[#allocation6 + $0x118] sm:$0xff]  ;;  %v96_v47 = vld [vmem:[#allocation6 + $0x100] sm:$0xff] }
  0x38   :  { %206 = vmatprep.subr.mxu0 %v129_v29  ;;  %283 = vmatprep.subr.mxu1 %v131_v30  ;;  %v98_v48 = vld [vmem:[#allocation6 + $0x110] sm:$0xff]  ;;  %v89_v49 = vld [vmem:[#allocation6 + $0xc8] sm:$0xff]  ;;  %v91_v50 = vld [vmem:[#allocation6 + $0xd8] sm:$0xff] }
  0x39   :  { %207 = vmatpush1.msra.mxu0 %v128_v31  ;;  %284 = vmatpush1.msra.mxu1 %v130_v32  ;;  %v88_v51 = vld [vmem:[#allocation6 + $0xc0] sm:$0xff]  ;;  %v90_v52 = vld [vmem:[#allocation6 + $0xd0] sm:$0xff]  ;;  %v81_v53 = vld [vmem:[#allocation6 + $0x88] sm:$0xff] }
  0x3a   :  { %208 = vmatprep.subr.mxu0 %v121_v33  ;;  %285 = vmatprep.subr.mxu1 %v123_v34  ;;  %v83_v54 = vld [vmem:[#allocation6 + $0x98] sm:$0xff]  ;;  %v80_v55 = vld [vmem:[#allocation6 + $0x80] sm:$0xff]  ;;  %v82_v56 = vld [vmem:[#allocation6 + $0x90] sm:$0xff] }
  0x3b   :  { %209 = vmatpush1.msra.mxu0 %v120_v35  ;;  %286 = vmatpush1.msra.mxu1 %v122_v36  ;;  %v73_v57 = vld [vmem:[#allocation6 + $0x48] sm:$0xff]  ;;  %v75_v58 = vld [vmem:[#allocation6 + $0x58] sm:$0xff]  ;;  %v72_v59 = vld [vmem:[#allocation6 + $0x40] sm:$0xff] }
  0x3c   :  { %210 = vmatprep.subr.mxu0 %v113_v37  ;;  %287 = vmatprep.subr.mxu1 %v115_v38  ;;  %v74_v60 = vld [vmem:[#allocation6 + $0x50] sm:$0xff]  ;;  %v65_v61 = vld [vmem:[#allocation6 + $0x8] sm:$0xff]  ;;  %v67_v62 = vld [vmem:[#allocation6 + $0x18] sm:$0xff] }
  0x3d   :  { %211 = vmatpush1.msra.mxu0 %v112_v39  ;;  %288 = vmatpush1.msra.mxu1 %v114_v40  ;;  %v64_v63 = vld [vmem:[#allocation6] sm:$0xff]  ;;  %v66_v1 = vld [vmem:[#allocation6 + $0x10] sm:$0xff]  ;;  %v189_v3 = vld [vmem:[#allocation6 + $0x3e8] sm:$0xff] }
  0x3e   :  { %212 = vmatprep.subr.mxu0 %v105_v41  ;;  %289 = vmatprep.subr.mxu1 %v107_v42  ;;  %v1066_v2 = vld [vmem:[#allocation3] sm:$0xff]  ;;  %v191_v4 = vld [vmem:[#allocation6 + $0x3f8] sm:$0xff]  ;;  %v188_v5 = vld [vmem:[#allocation6 + $0x3e0] sm:$0xff] }
  0x3f   :  { %213 = vmatpush1.msra.mxu0 %v104_v43  ;;  %290 = vmatpush1.msra.mxu1 %v106_v44  ;;  %v190_v6 = vld [vmem:[#allocation6 + $0x3f0] sm:$0xff]  ;;  %v181_v7 = vld [vmem:[#allocation6 + $0x3a8] sm:$0xff]  ;;  %v183_v8 = vld [vmem:[#allocation6 + $0x3b8] sm:$0xff] }
  0x40   :  { %214 = vmatprep.subr.mxu0 %v97_v45  ;;  %291 = vmatprep.subr.mxu1 %v99_v46  ;;  %v180_v9 = vld [vmem:[#allocation6 + $0x3a0] sm:$0xff]  ;;  %v182_v10 = vld [vmem:[#allocation6 + $0x3b0] sm:$0xff]  ;;  %v1070_v11 = vld [vmem:[#allocation3 + $0x8] sm:$0xff] }
  0x41   :  { %215 = vmatpush1.msra.mxu0 %v96_v47  ;;  %292 = vmatpush1.msra.mxu1 %v98_v48  ;;  %v173_v12 = vld [vmem:[#allocation6 + $0x368] sm:$0xff]  ;;  %v175_v13 = vld [vmem:[#allocation6 + $0x378] sm:$0xff]  ;;  %v172_v14 = vld [vmem:[#allocation6 + $0x360] sm:$0xff] }
  0x42   :  { %216 = vmatprep.subr.mxu0 %v89_v49  ;;  %293 = vmatprep.subr.mxu1 %v91_v50  ;;  %v174_v15 = vld [vmem:[#allocation6 + $0x370] sm:$0xff]  ;;  %v165_v16 = vld [vmem:[#allocation6 + $0x328] sm:$0xff]  ;;  %v167_v17 = vld [vmem:[#allocation6 + $0x338] sm:$0xff] }
  0x43   :  { %217 = vmatpush1.msra.mxu0 %v88_v51  ;;  %294 = vmatpush1.msra.mxu1 %v90_v52  ;;  %v164_v18 = vld [vmem:[#allocation6 + $0x320] sm:$0xff]  ;;  %v166_v19 = vld [vmem:[#allocation6 + $0x330] sm:$0xff]  ;;  %v157_v20 = vld [vmem:[#allocation6 + $0x2e8] sm:$0xff] }
  0x44   :  { %218 = vmatprep.subr.mxu0 %v81_v53  ;;  %295 = vmatprep.subr.mxu1 %v83_v54  ;;  %v159_v21 = vld [vmem:[#allocation6 + $0x2f8] sm:$0xff]  ;;  %v156_v22 = vld [vmem:[#allocation6 + $0x2e0] sm:$0xff]  ;;  %v158_v23 = vld [vmem:[#allocation6 + $0x2f0] sm:$0xff] }
  0x45   :  { %219 = vmatpush1.msra.mxu0 %v80_v55  ;;  %296 = vmatpush1.msra.mxu1 %v82_v56  ;;  %v149_v24 = vld [vmem:[#allocation6 + $0x2a8] sm:$0xff]  ;;  %v151_v25 = vld [vmem:[#allocation6 + $0x2b8] sm:$0xff]  ;;  %v148_v26 = vld [vmem:[#allocation6 + $0x2a0] sm:$0xff] }
  0x46   :  { %220 = vmatprep.subr.mxu0 %v73_v57  ;;  %297 = vmatprep.subr.mxu1 %v75_v58  ;;  %v150_v27 = vld [vmem:[#allocation6 + $0x2b0] sm:$0xff]  ;;  %v141_v28 = vld [vmem:[#allocation6 + $0x268] sm:$0xff]  ;;  %v143_v29 = vld [vmem:[#allocation6 + $0x278] sm:$0xff] }
  0x47   :  { %221 = vmatpush1.msra.mxu0 %v72_v59  ;;  %298 = vmatpush1.msra.mxu1 %v74_v60  ;;  %v140_v30 = vld [vmem:[#allocation6 + $0x260] sm:$0xff]  ;;  %v142_v31 = vld [vmem:[#allocation6 + $0x270] sm:$0xff]  ;;  %v133_v32 = vld [vmem:[#allocation6 + $0x228] sm:$0xff] }
  0x48   :  { %222 = vmatprep.subr.mxu0 %v65_v61  ;;  %299 = vmatprep.subr.mxu1 %v67_v62  ;;  %v135_v33 = vld [vmem:[#allocation6 + $0x238] sm:$0xff]  ;;  %v132_v34 = vld [vmem:[#allocation6 + $0x220] sm:$0xff]  ;;  %v134_v35 = vld [vmem:[#allocation6 + $0x230] sm:$0xff] }
  0x49   :  { %223 = vmatpush1.msra.mxu0 %v64_v63  ;;  %300 = vmatpush1.msra.mxu1 %v66_v1  ;;  %v125_v36 = vld [vmem:[#allocation6 + $0x1e8] sm:$0xff]  ;;  %v127_v37 = vld [vmem:[#allocation6 + $0x1f8] sm:$0xff]  ;;  %v124_v38 = vld [vmem:[#allocation6 + $0x1e0] sm:$0xff] }
  0x4a   :  { %257 = vmatmul.mubr.f32.vlgmr.msra.gmra.mxu0 %v1066_v2  ;;  %334 = vmatmul.mubr.f32.vlgmr.msra.gmra.mxu1 %v1066_v2  ;;  %v126_v39 = vld [vmem:[#allocation6 + $0x1f0] sm:$0xff]  ;;  %v117_v40 = vld [vmem:[#allocation6 + $0x1a8] sm:$0xff]  ;;  %v119_v41 = vld [vmem:[#allocation6 + $0x1b8] sm:$0xff] }
  0x4b   :  { %346 = vmatprep.subr.mxu0 %v189_v3  ;;  %423 = vmatprep.subr.mxu1 %v191_v4  ;;  %v116_v42 = vld [vmem:[#allocation6 + $0x1a0] sm:$0xff]  ;;  %v118_v43 = vld [vmem:[#allocation6 + $0x1b0] sm:$0xff]  ;;  %v109_v44 = vld [vmem:[#allocation6 + $0x168] sm:$0xff] }
  0x4c   :  { %347 = vmatpush1.msra.mxu0 %v188_v5  ;;  %424 = vmatpush1.msra.mxu1 %v190_v6  ;;  %v111_v45 = vld [vmem:[#allocation6 + $0x178] sm:$0xff]  ;;  %v108_v46 = vld [vmem:[#allocation6 + $0x160] sm:$0xff]  ;;  %v110_v47 = vld [vmem:[#allocation6 + $0x170] sm:$0xff] }
  0x4d   :  { %348 = vmatprep.subr.mxu0 %v181_v7  ;;  %425 = vmatprep.subr.mxu1 %v183_v8  ;;  %v101_v48 = vld [vmem:[#allocation6 + $0x128] sm:$0xff]  ;;  %v103_v49 = vld [vmem:[#allocation6 + $0x138] sm:$0xff]  ;;  %v100_v50 = vld [vmem:[#allocation6 + $0x120] sm:$0xff] }
  0x4e   :  { %262 = vmatprep.mubr.f32.mxu0 %v1027_v0  ;;  %339 = vmatprep.mubr.f32.mxu1 %v1027_v0  ;;  %v102_v51 = vld [vmem:[#allocation6 + $0x130] sm:$0xff]  ;;  %v93_v52 = vld [vmem:[#allocation6 + $0xe8] sm:$0xff]  ;;  %v95_v53 = vld [vmem:[#allocation6 + $0xf8] sm:$0xff] }
  0x4f   :  { %349 = vmatpush1.msra.mxu0 %v180_v9  ;;  %426 = vmatpush1.msra.mxu1 %v182_v10  ;;  %v92_v54 = vld [vmem:[#allocation6 + $0xe0] sm:$0xff]  ;;  %v94_v55 = vld [vmem:[#allocation6 + $0xf0] sm:$0xff]  ;;  %v85_v56 = vld [vmem:[#allocation6 + $0xa8] sm:$0xff] }
  0x50   :  { %263 = vmatmul.mubr.f32.gmra.mxu0 %v1070_v11  ;;  %340 = vmatmul.mubr.f32.gmra.mxu1 %v1070_v11  ;;  %v87_v57 = vld [vmem:[#allocation6 + $0xb8] sm:$0xff]  ;;  %v84_v58 = vld [vmem:[#allocation6 + $0xa0] sm:$0xff]  ;;  %v86_v59 = vld [vmem:[#allocation6 + $0xb0] sm:$0xff] }
  0x51   :  { %350 = vmatprep.subr.mxu0 %v173_v12  ;;  %427 = vmatprep.subr.mxu1 %v175_v13  ;;  %v77_v60 = vld [vmem:[#allocation6 + $0x68] sm:$0xff]  ;;  %v79_v61 = vld [vmem:[#allocation6 + $0x78] sm:$0xff]  ;;  %v76_v62 = vld [vmem:[#allocation6 + $0x60] sm:$0xff] }
  0x52   :  { %351 = vmatpush1.msra.mxu0 %v172_v14  ;;  %428 = vmatpush1.msra.mxu1 %v174_v15  ;;  %v78_v63 = vld [vmem:[#allocation6 + $0x70] sm:$0xff]  ;;  %v69_v1 = vld [vmem:[#allocation6 + $0x28] sm:$0xff]  ;;  %v71_v3 = vld [vmem:[#allocation6 + $0x38] sm:$0xff] }
  0x53   :  { %352 = vmatprep.subr.mxu0 %v165_v16  ;;  %429 = vmatprep.subr.mxu1 %v167_v17  ;;  %v68_v4 = vld [vmem:[#allocation6 + $0x20] sm:$0xff]  ;;  %v70_v5 = vld [vmem:[#allocation6 + $0x30] sm:$0xff]  ;;  %v597_v6 = vld [vmem:[#allocation8 + $0xf8] sm:$0xff] }
  0x54   :  { %353 = vmatpush1.msra.mxu0 %v164_v18  ;;  %430 = vmatpush1.msra.mxu1 %v166_v19  ;;  %v629_v7 = vld [vmem:[#allocation8 + $0x1f8] sm:$0xff]  ;;  %v596_v10 = vld [vmem:[#allocation8 + $0xf0] sm:$0xff]  ;;  %v627_v14 = vld [vmem:[#allocation8 + $0x1e8] sm:$0xff] }
  0x55   :  { %354 = vmatprep.subr.mxu0 %v157_v20  ;;  %431 = vmatprep.subr.mxu1 %v159_v21  ;;  %v581_v8 = vld [vmem:[#allocation8 + $0x78] sm:$0xff]  ;;  %v628_v12 = vld [vmem:[#allocation8 + $0x1f0] sm:$0xff]  ;;  %v611_v15 = vld [vmem:[#allocation8 + $0x168] sm:$0xff] }
  0x56   :  { %355 = vmatpush1.msra.mxu0 %v156_v22  ;;  %432 = vmatpush1.msra.mxu1 %v158_v23  ;;  %v613_v9 = vld [vmem:[#allocation8 + $0x178] sm:$0xff]  ;;  %v612_v13 = vld [vmem:[#allocation8 + $0x170] sm:$0xff]  ;;  %v594_v16 = vld [vmem:[#allocation8 + $0xe0] sm:$0xff] }
  0x57   :  { %356 = vmatprep.subr.mxu0 %v149_v24  ;;  %433 = vmatprep.subr.mxu1 %v151_v25  ;;  %v626_v17 = vld [vmem:[#allocation8 + $0x1e0] sm:$0xff]  ;;  %v593_v20 = vld [vmem:[#allocation8 + $0xd8] sm:$0xff]  ;;  %v592_v24 = vld [vmem:[#allocation8 + $0xd0] sm:$0xff] }
  0x58   :  { %357 = vmatpush1.msra.mxu0 %v148_v26  ;;  %434 = vmatpush1.msra.mxu1 %v150_v27  ;;  %v578_v18 = vld [vmem:[#allocation8 + $0x60] sm:$0xff]  ;;  %v625_v21 = vld [vmem:[#allocation8 + $0x1d8] sm:$0xff]  ;;  %v624_v25 = vld [vmem:[#allocation8 + $0x1d0] sm:$0xff] }
  0x59   :  { %358 = vmatprep.subr.mxu0 %v141_v28  ;;  %435 = vmatprep.subr.mxu1 %v143_v29  ;;  %v610_v19 = vld [vmem:[#allocation8 + $0x160] sm:$0xff]  ;;  %v577_v22 = vld [vmem:[#allocation8 + $0x58] sm:$0xff]  ;;  %v576_v26 = vld [vmem:[#allocation8 + $0x50] sm:$0xff] }
  0x5a   :  { %359 = vmatpush1.msra.mxu0 %v140_v30  ;;  %436 = vmatpush1.msra.mxu1 %v142_v31  ;;  %v609_v23 = vld [vmem:[#allocation8 + $0x158] sm:$0xff]  ;;  %v608_v27 = vld [vmem:[#allocation8 + $0x150] sm:$0xff]  ;;  %v591_v28 = vld [vmem:[#allocation8 + $0xc8] sm:$0xff] }
  0x5b   :  { %360 = vmatprep.subr.mxu0 %v133_v32  ;;  %437 = vmatprep.subr.mxu1 %v135_v33  ;;  %v623_v29 = vld [vmem:[#allocation8 + $0x1c8] sm:$0xff]  ;;  %v590_v32 = vld [vmem:[#allocation8 + $0xc0] sm:$0xff] }
  0x5c   :  { %361 = vmatpush1.msra.mxu0 %v132_v34  ;;  %438 = vmatpush1.msra.mxu1 %v134_v35  ;;  %v575_v30 = vld [vmem:[#allocation8 + $0x48] sm:$0xff]  ;;  %v622_v33 = vld [vmem:[#allocation8 + $0x1c0] sm:$0xff] }
  0x5d   :  { %362 = vmatprep.subr.mxu0 %v125_v36  ;;  %439 = vmatprep.subr.mxu1 %v127_v37  ;;  %v607_v31 = vld [vmem:[#allocation8 + $0x148] sm:$0xff]  ;;  %v574_v34 = vld [vmem:[#allocation8 + $0x40] sm:$0xff]  ;;  %v589_v36 = vld [vmem:[#allocation8 + $0xb8] sm:$0xff] }
  0x5e   :  { %363 = vmatpush1.msra.mxu0 %v124_v38  ;;  %440 = vmatpush1.msra.mxu1 %v126_v39  ;;  %v606_v35 = vld [vmem:[#allocation8 + $0x140] sm:$0xff]  ;;  %v621_v37 = vld [vmem:[#allocation8 + $0x1b8] sm:$0xff] }
  0x5f   :  { %364 = vmatprep.subr.mxu0 %v117_v40  ;;  %441 = vmatprep.subr.mxu1 %v119_v41  ;;  %v573_v38 = vld [vmem:[#allocation8 + $0x38] sm:$0xff]  ;;  %v588_v40 = vld [vmem:[#allocation8 + $0xb0] sm:$0xff] }
  0x60   :  { %365 = vmatpush1.msra.mxu0 %v116_v42  ;;  %442 = vmatpush1.msra.mxu1 %v118_v43  ;;  %v605_v39 = vld [vmem:[#allocation8 + $0x138] sm:$0xff]  ;;  %v620_v41 = vld [vmem:[#allocation8 + $0x1b0] sm:$0xff] }
  0x61   :  { %366 = vmatprep.subr.mxu0 %v109_v44  ;;  %443 = vmatprep.subr.mxu1 %v111_v45  ;;  %v572_v42 = vld [vmem:[#allocation8 + $0x30] sm:$0xff]  ;;  %v587_v44 = vld [vmem:[#allocation8 + $0xa8] sm:$0xff] }
  0x62   :  { %367 = vmatpush1.msra.mxu0 %v108_v46  ;;  %444 = vmatpush1.msra.mxu1 %v110_v47  ;;  %v604_v43 = vld [vmem:[#allocation8 + $0x130] sm:$0xff]  ;;  %v619_v45 = vld [vmem:[#allocation8 + $0x1a8] sm:$0xff] }
  0x63   :  { %368 = vmatprep.subr.mxu0 %v101_v48  ;;  %445 = vmatprep.subr.mxu1 %v103_v49  ;;  %v571_v46 = vld [vmem:[#allocation8 + $0x28] sm:$0xff]  ;;  %v586_v48 = vld [vmem:[#allocation8 + $0xa0] sm:$0xff] }
  0x64   :  { %369 = vmatpush1.msra.mxu0 %v100_v50  ;;  %446 = vmatpush1.msra.mxu1 %v102_v51  ;;  %v603_v47 = vld [vmem:[#allocation8 + $0x128] sm:$0xff]  ;;  %v618_v49 = vld [vmem:[#allocation8 + $0x1a0] sm:$0xff] }
  0x65   :  { %370 = vmatprep.subr.mxu0 %v93_v52  ;;  %447 = vmatprep.subr.mxu1 %v95_v53  ;;  %v570_v50 = vld [vmem:[#allocation8 + $0x20] sm:$0xff]  ;;  %v585_v52 = vld [vmem:[#allocation8 + $0x98] sm:$0xff] }
  0x66   :  { %371 = vmatpush1.msra.mxu0 %v92_v54  ;;  %448 = vmatpush1.msra.mxu1 %v94_v55  ;;  %v602_v51 = vld [vmem:[#allocation8 + $0x120] sm:$0xff]  ;;  %v617_v53 = vld [vmem:[#allocation8 + $0x198] sm:$0xff] }
  0x67   :  { %372 = vmatprep.subr.mxu0 %v85_v56  ;;  %449 = vmatprep.subr.mxu1 %v87_v57  ;;  %v569_v54 = vld [vmem:[#allocation8 + $0x18] sm:$0xff]  ;;  %v584_v56 = vld [vmem:[#allocation8 + $0x90] sm:$0xff] }
  0x68   :  { %373 = vmatpush1.msra.mxu0 %v84_v58  ;;  %450 = vmatpush1.msra.mxu1 %v86_v59  ;;  %v601_v55 = vld [vmem:[#allocation8 + $0x118] sm:$0xff]  ;;  %v616_v57 = vld [vmem:[#allocation8 + $0x190] sm:$0xff] }
  0x69   :  { %374 = vmatprep.subr.mxu0 %v77_v60  ;;  %451 = vmatprep.subr.mxu1 %v79_v61  ;;  %v568_v58 = vld [vmem:[#allocation8 + $0x10] sm:$0xff]  ;;  %v583_v60 = vld [vmem:[#allocation8 + $0x88] sm:$0xff] }
  0x6a   :  { %375 = vmatpush1.msra.mxu0 %v76_v62  ;;  %452 = vmatpush1.msra.mxu1 %v78_v63  ;;  %v600_v59 = vld [vmem:[#allocation8 + $0x110] sm:$0xff]  ;;  %v615_v61 = vld [vmem:[#allocation8 + $0x188] sm:$0xff] }
  0x6b   :  { %376 = vmatprep.subr.mxu0 %v69_v1  ;;  %453 = vmatprep.subr.mxu1 %v71_v3  ;;  %v567_v62 = vld [vmem:[#allocation8 + $0x8] sm:$0xff]  ;;  %v582_v1 = vld [vmem:[#allocation8 + $0x80] sm:$0xff] }
  0x6c   :  { %377 = vmatpush1.msra.mxu0 %v68_v4  ;;  %410 = vmatprep.mubr.f32.mxu0 %v1027_v0  ;;  %v599_v63 = vld [vmem:[#allocation8 + $0x108] sm:$0xff]  ;;  %v614_v3 = vld [vmem:[#allocation8 + $0x180] sm:$0xff] }
  0x6d   :  { %454 = vmatpush1.msra.mxu1 %v70_v5  ;;  %487 = vmatprep.mubr.f32.mxu1 %v1027_v0  ;;  %v566_v4 = vld [vmem:[#allocation8] sm:$0xff] }
  0x6e   :  { %411 = vmatmul.mubr.f32.vlgmr.msra.gmra.mxu0 %v1066_v2  ;;  %488 = vmatmul.mubr.f32.vlgmr.msra.gmra.mxu1 %v1066_v2  ;;  %v580_v2 = vld [vmem:[#allocation8 + $0x70] sm:$0xff]  ;;  %v598_v5 = vld [vmem:[#allocation8 + $0x100] sm:$0xff] }
  0x6f   :  { %416 = vmatprep.mubr.f32.mxu0 %v1027_v0  ;;  %493 = vmatprep.mubr.f32.mxu1 %v1027_v0  ;;  %v595_v0 = vld [vmem:[#allocation8 + $0xe8] sm:$0xff] }
  0x70   :  { %817 = vmatprep.subr.mxu0 %v597_v6  ;;  %855 = vmatprep.subr.mxu1 %v629_v7 }
  0x71   :  { %818 = vmatpush3.msra.mxu0 %v581_v8  ;;  %856 = vmatpush3.msra.mxu1 %v613_v9 }
  0x72   :  { %417 = vmatmul.mubr.f32.gmra.mxu0 %v1070_v11  ;;  %494 = vmatmul.mubr.f32.gmra.mxu1 %v1070_v11  ;;  %v579_v11 = vld [vmem:[#allocation8 + $0x68] sm:$0xff] }
  0x73   :  { %819 = vmatprep.subr.mxu0 %v596_v10  ;;  %857 = vmatprep.subr.mxu1 %v628_v12 }
  0x74   :  { %820 = vmatpush3.msra.mxu0 %v580_v2  ;;  %858 = vmatpush3.msra.mxu1 %v612_v13 }
  0x75   :  { %821 = vmatprep.subr.mxu0 %v595_v0  ;;  %859 = vmatprep.subr.mxu1 %v627_v14 }
  0x76   :  { %822 = vmatpush3.msra.mxu0 %v579_v11  ;;  %860 = vmatpush3.msra.mxu1 %v611_v15 }
  0x77   :  { %823 = vmatprep.subr.mxu0 %v594_v16  ;;  %861 = vmatprep.subr.mxu1 %v626_v17 }
  0x78   :  { %824 = vmatpush3.msra.mxu0 %v578_v18  ;;  %862 = vmatpush3.msra.mxu1 %v610_v19 }
  0x79   :  { %825 = vmatprep.subr.mxu0 %v593_v20  ;;  %863 = vmatprep.subr.mxu1 %v625_v21 }
  0x7a   :  { %826 = vmatpush3.msra.mxu0 %v577_v22  ;;  %864 = vmatpush3.msra.mxu1 %v609_v23 }
  0x7b   :  { %827 = vmatprep.subr.mxu0 %v592_v24  ;;  %865 = vmatprep.subr.mxu1 %v624_v25 }
  0x7c   :  { %828 = vmatpush3.msra.mxu0 %v576_v26  ;;  %866 = vmatpush3.msra.mxu1 %v608_v27 }
  0x7d   :  { %829 = vmatprep.subr.mxu0 %v591_v28  ;;  %867 = vmatprep.subr.mxu1 %v623_v29 }
  0x7e   :  { %830 = vmatpush3.msra.mxu0 %v575_v30  ;;  %868 = vmatpush3.msra.mxu1 %v607_v31 }
  0x7f   :  { %831 = vmatprep.subr.mxu0 %v590_v32  ;;  %869 = vmatprep.subr.mxu1 %v622_v33 }
  0x80   :  { %832 = vmatpush3.msra.mxu0 %v574_v34  ;;  %870 = vmatpush3.msra.mxu1 %v606_v35 }
  0x81   :  { %833 = vmatprep.subr.mxu0 %v589_v36  ;;  %871 = vmatprep.subr.mxu1 %v621_v37 }
  0x82   :  { %834 = vmatpush3.msra.mxu0 %v573_v38  ;;  %872 = vmatpush3.msra.mxu1 %v605_v39 }
  0x83   :  { %835 = vmatprep.subr.mxu0 %v588_v40  ;;  %873 = vmatprep.subr.mxu1 %v620_v41 }
  0x84   :  { %836 = vmatpush3.msra.mxu0 %v572_v42  ;;  %874 = vmatpush3.msra.mxu1 %v604_v43 }
  0x85   :  { %837 = vmatprep.subr.mxu0 %v587_v44  ;;  %875 = vmatprep.subr.mxu1 %v619_v45 }
  0x86   :  { %838 = vmatpush3.msra.mxu0 %v571_v46  ;;  %876 = vmatpush3.msra.mxu1 %v603_v47 }
  0x87   :  { %839 = vmatprep.subr.mxu0 %v586_v48  ;;  %877 = vmatprep.subr.mxu1 %v618_v49 }
  0x88   :  { %840 = vmatpush3.msra.mxu0 %v570_v50  ;;  %878 = vmatpush3.msra.mxu1 %v602_v51 }
  0x89   :  { %841 = vmatprep.subr.mxu0 %v585_v52  ;;  %879 = vmatprep.subr.mxu1 %v617_v53 }
  0x8a   :  { %842 = vmatpush3.msra.mxu0 %v569_v54  ;;  %880 = vmatpush3.msra.mxu1 %v601_v55 }
  0x8b   :  { %843 = vmatprep.subr.mxu0 %v584_v56  ;;  %881 = vmatprep.subr.mxu1 %v616_v57 }
  0x8c   :  { %844 = vmatpush3.msra.mxu0 %v568_v58  ;;  %882 = vmatpush3.msra.mxu1 %v600_v59 }
  0x8d   :  { %845 = vmatprep.subr.mxu0 %v583_v60  ;;  %883 = vmatprep.subr.mxu1 %v615_v61 }
  0x8e   :  { %846 = vmatpush3.msra.mxu0 %v567_v62  ;;  %884 = vmatpush3.msra.mxu1 %v599_v63 }
  0x8f   :  { %847 = vmatprep.subr.mxu0 %v582_v1  ;;  %885 = vmatprep.subr.mxu1 %v614_v3 }
  0x90   :  { %848 = vmatpush3.msra.mxu0 %v566_v4  ;;  %886 = vmatpush3.msra.mxu1 %v598_v5 }
 0x10a   :  { %v258_v6 = vpop.f32.mrf.mxu0  ;;  %v335_v7 = vpop.f32.mrf.mxu1 }
 0x10b   :  { %v809_v8 = vmul.f32 -1.442695, %v258_v6  ;;  %v811_v9 = vmul.f32 -1.442695, %v335_v7 }
 0x10c   :  { %v260_v10 = vpop.f32.mrf.mxu0  ;;  %v337_v12 = vpop.f32.mrf.mxu1 }
 0x10d   :  { %902 = vpow2.f32 %v809_v8  ;;  %v810_v2 = vmul.f32 -1.442695, %v260_v10  ;;  %v812_v13 = vmul.f32 -1.442695, %v337_v12 }
 0x10e   :  { %904 = vpow2.f32 %v811_v9 }
 0x10f   :  { %906 = vpow2.f32 %v810_v2 }
 0x110   :  { %908 = vpow2.f32 %v812_v13  ;;  %v264_v0 = vpop.f32.mrf.mxu0  ;;  %v341_v14 = vpop.f32.mrf.mxu1 }
 0x111   :  { %v813_v11 = vmul.f32 -1.442695, %v264_v0  ;;  %v815_v15 = vmul.f32 -1.442695, %v341_v14 }
 0x112   :  { %v266_v16 = vpop.f32.mrf.mxu0  ;;  %v343_v17 = vpop.f32.mrf.mxu1 }
 0x113   :  { %910 = vpow2.f32 %v813_v11  ;;  %v814_v18 = vmul.f32 -1.442695, %v266_v16  ;;  %v816_v19 = vmul.f32 -1.442695, %v343_v17 }
 0x114   :  { %912 = vpow2.f32 %v815_v15 }
 0x115   :  { %914 = vpow2.f32 %v814_v18 }
 0x116   :  { %916 = vpow2.f32 %v816_v19 }
 0x11a   :  { %v903_v20 = vpop.eup %902 }
 0x11b   :  { %v905_v21 = vpop.eup %904  ;;  %v524_v22 = vadd.f32 1.0, %v903_v20 }
 0x11c   :  { %v907_v23 = vpop.eup %906  ;;  %v526_v24 = vadd.f32 1.0, %v905_v21 }
 0x11d   :  { %v909_v25 = vpop.eup %908  ;;  %918 = vrcp.f32 %v524_v22  ;;  %v525_v26 = vadd.f32 1.0, %v907_v23 }
 0x11e   :  { %920 = vrcp.f32 %v526_v24  ;;  %v527_v27 = vadd.f32 1.0, %v909_v25 }
 0x11f   :  { %922 = vrcp.f32 %v525_v26 }
 0x120   :  { %v911_v28 = vpop.eup %910  ;;  %924 = vrcp.f32 %v527_v27 }
 0x121   :  { %v913_v29 = vpop.eup %912  ;;  %v528_v30 = vadd.f32 1.0, %v911_v28 }
 0x122   :  { %v915_v31 = vpop.eup %914  ;;  %v530_v32 = vadd.f32 1.0, %v913_v29 }
 0x123   :  { %v917_v33 = vpop.eup %916  ;;  %926 = vrcp.f32 %v528_v30  ;;  %v529_v34 = vadd.f32 1.0, %v915_v31 }
 0x124   :  { %928 = vrcp.f32 %v530_v32  ;;  %v531_v35 = vadd.f32 1.0, %v917_v33 }
 0x125   :  { %930 = vrcp.f32 %v529_v34 }
 0x126   :  { %932 = vrcp.f32 %v531_v35 }
 0x12a   :  { %v919_v36 = vpop.eup %918 }
 0x12b   :  { %v921_v37 = vpop.eup %920  ;;  %v548_v41 = vmul.f32 %v919_v36, %v258_v6 }
 0x12c   :  { %v923_v38 = vpop.eup %922  ;;  %v550_v42 = vmul.f32 %v921_v37, %v335_v7 }
 0x12d   :  { %v925_v39 = vpop.eup %924  ;;  %v549_v40 = vmul.f32 %v923_v38, %v260_v10 }
 0x12e   :  { %v551_v43 = vmul.f32 %v925_v39, %v337_v12  ;;  %v412_v44 = vpop.f32.mrf.mxu0  ;;  %v489_v45 = vpop.f32.mrf.mxu1 }
 0x12f   :  { %v556_v54 = vmul.f32 %v548_v41, %v412_v44  ;;  %v558_v55 = vmul.f32 %v550_v42, %v489_v45 }
 0x130   :  { %v927_v46 = vpop.eup %926  ;;  %v414_v47 = vpop.f32.mrf.mxu0 }
 0x131   :  { %v491_v48 = vpop.f32.mrf.mxu1  ;;  %v929_v49 = vpop.eup %928  ;;  %v557_v50 = vmul.f32 %v549_v40, %v414_v47  ;;  %v552_v53 = vmul.f32 %v927_v46, %v264_v0 }
 0x132   :  { %v559_v51 = vmul.f32 %v551_v43, %v491_v48  ;;  %v931_v52 = vpop.eup %930  ;;  %v418_v56 = vpop.f32.mrf.mxu0  ;;  %v554_v59 = vmul.f32 %v929_v49, %v341_v14 }
 0x133   :  { %v495_v57 = vpop.f32.mrf.mxu1  ;;  %v933_v58 = vpop.eup %932  ;;  %v553_v60 = vmul.f32 %v931_v52, %v266_v16  ;;  %694 = vmatprep.mubr.f32.mxu0 %v557_v50  ;;  %v560_v3 = vmul.f32 %v552_v53, %v418_v56 }
 0x134   :  { %769 = vmatprep.mubr.f32.mxu1 %v559_v51  ;;  %v555_v61 = vmul.f32 %v933_v58, %v343_v17  ;;  %v420_v62 = vpop.f32.mrf.mxu0  ;;  %695 = vmatmul.mubr.f32.vlgmr.msra.gmra.mxu0 %v556_v54  ;;  %v562_v5 = vmul.f32 %v554_v59, %v495_v57 }
 0x135   :  { %770 = vmatmul.mubr.f32.vlgmr.msra.gmra.mxu1 %v558_v55  ;;  %v561_v63 = vmul.f32 %v553_v60, %v420_v62  ;;  %v497_v1 = vpop.f32.mrf.mxu1 }
 0x136   :  { %v563_v4 = vmul.f32 %v555_v61, %v497_v1 }
 0x137   :  { %699 = vmatprep.mubr.f32.mxu0 %v561_v63 }
 0x138   :  { %774 = vmatprep.mubr.f32.mxu1 %v563_v4  ;;  %700 = vmatmul.mubr.f32.gmra.mxu0 %v560_v3 }
 0x139   :  { %775 = vmatmul.mubr.f32.gmra.mxu1 %v562_v5 }
 0x1f4   :  { %v849_v6 = vpop.f32.mrf.mxu0 }
 0x1f5   :  { %v887_v7 = vpop.f32.mrf.mxu1 }
 0x1f6   :  { %v850_v8 = vpop.f32.mrf.mxu0 }
 0x1f7   :  { %v888_v9 = vpop.f32.mrf.mxu1  ;;  %v851_v10 = vadd.f32 %v850_v8, %v849_v6 }
 0x1f8   :  { %v889_v12 = vadd.f32 %v888_v9, %v887_v7  ;;  %v852_v2 = vpop.f32.mrf.mxu0 }
 0x1f9   :  { %v890_v0 = vpop.f32.mrf.mxu1 }
 0x1fa   :  { %v772_v13 = vadd.f32 %v889_v12, %v851_v10  ;;  %v853_v14 = vpop.f32.mrf.mxu0 }
 0x1fb   :  { %v854_v11 = vadd.f32 %v853_v14, %v852_v2  ;;  %v891_v15 = vpop.f32.mrf.mxu1 }
 0x1fc   :  { %789 = vst [vmem:[#allocation9] sm:$0xff] %v772_v13  ;;  %v892_v16 = vadd.f32 %v891_v15, %v890_v0 }
 0x1fe   :  { %v777_v17 = vadd.f32 %v892_v16, %v854_v11 }
 0x200   :  { %790 = vst [vmem:[#allocation9 + $0x8] sm:$0xff] %v777_v17 }
 0x201   :  { %1005 = shalt.err (!%p1002_p5)
}
 0x202   :  { %802 = dma.vmem_to_hbm [thread:$0]  %s797_s2, 256, %s1093_s3, [#allocation5], %s1024_s22, %s1024_s22, %s1025_s23  }
 0x203   :  { %1018 = dma.done.wait [#allocation5], 256  }
 0x204   :  { %1019 = vsyncadd [#allocation5], 4294967040 }
 0x205   :  { %806 = vsyncpa [#allocation4], 1 }
 0x206   :  { %807 = vsyncpa [#allocation7], 1 }
 0x207   :  { %808 = vsyncpa [#allocation5], 1 }

</bundles_post_ra>
